<compile_context>
chip_gen: v7x
topology: tpu7x:2x2x1
jax: 0.10.0
libtpu: 0.0.40
codegen_flags: <defaults>
</compile_context>

<pallas_src>
import math
import functools

import jax
import jax.numpy as jnp
from jax import lax
from jax.experimental import pallas as pl
from jax.experimental.pallas import tpu as pltpu


_LANE = 128
_SUBLANE = 8
# Output-block targets: ~2-4 MiB blocks are at the knee of the measured HBM
# roofline curve; train-mode target is halved because the fused dropout mask
# (an int32 slab the size of the f32 accumulator) doubles the live working set.
_EVAL_BLOCK_BYTES = 4 * 1024 * 1024
_TRAIN_BLOCK_BYTES = 2 * 1024 * 1024
# Explicit scoped-VMEM limit: raises v5e's 16 MiB default, stays well below
# v7x's 64 MiB physical VMEM (v5e/v6e have 128 MiB physical).
_VMEM_LIMIT_BYTES = 48 * 1024 * 1024


def _round_up(x, m):
    return (x + m - 1) // m * m


# ----------------------------------------------------------------------
# Parameter construction (mirrors TokenEmbedding.__init__: Conv1d weight with
# kaiming_normal_(mode='fan_in', nonlinearity='leaky_relu', a=0)).
# Returns the torch-layout weight (d_model, c_in, 3) and the kernel weight
# stacked per tap: w_stack[k] = w[:, :, k].T, shape (3, c_in, d_model).
# ----------------------------------------------------------------------
def init_token_embedding(key, c_in, d_model, dtype=jnp.float32):
    fan_in = c_in * 3
    gain = math.sqrt(2.0)                        # leaky_relu, a=0 (torch default)
    std = gain / math.sqrt(fan_in)
    w = std * jax.random.normal(key, (d_model, c_in, 3), dtype=jnp.float32)
    w_stack = jnp.transpose(w, (2, 1, 0))        # (3, c_in, d_model)
    return w.astype(dtype), w_stack.astype(dtype)


# ----------------------------------------------------------------------
# In-kernel helpers
# ----------------------------------------------------------------------
def _three_tap_matmul(xm1, x0, xp1, w_ref):
    """y = x[t-1] @ W0 + x[t] @ W1 + x[t+1] @ W2 on the MXU (f32 accumulate).

    Three accumulating (rows, C) @ (C, Dp) dots instead of one (rows, 3C) dot:
    avoids the lane-concat of a 3C-wide tile; the MXU has huge slack anyway
    (the kernel is HBM-bound)."""
    y = jnp.dot(xm1, w_ref[0], preferred_element_type=jnp.float32)
    y = y + jnp.dot(x0, w_ref[1], preferred_element_type=jnp.float32)
    y = y + jnp.dot(xp1, w_ref[2], preferred_element_type=jnp.float32)
    return y


def _mix32(h):
    """Integer avalanche mixer (lowbias32-style) on int32 vectors.

    Logical right shift is emulated as `(h >> 16) & 0xFFFF` so everything stays
    in int32 (arithmetic shift + mask == logical shift by 16)."""
    m = jnp.int32(0x045D9F3B)
    h = (h ^ ((h >> 16) & jnp.int32(0xFFFF))) * m
    h = (h ^ ((h >> 16) & jnp.int32(0xFFFF))) * m
    h = h ^ ((h >> 16) & jnp.int32(0xFFFF))
    return h


def _apply_dropout(y, *, p, seed, rows_per_block):
    """Fused inverted dropout on the f32 accumulator.

    Counter-based hash of (global_row, col, seed) on the VPU: integer
    mul/xor/shift are free filler for an HBM-bound kernel, per-block streams are
    decorrelated by construction, the mask does not depend on the tiling, and
    (unlike pltpu.prng_*) it lowers on every backend, including the interpreter.
    # TODO(synk): matches torch.nn.Dropout in distribution only, not bit-for-bit.
    """
    if p is None or p <= 0.0:
        return y
    row = (lax.broadcasted_iota(jnp.int32, y.shape, 0)
           + pl.program_id(0) * rows_per_block)
    col = lax.broadcasted_iota(jnp.int32, y.shape, 1)
    h = (row * jnp.int32(1640531527)             # 0x61C88647
         + col * jnp.int32(625108113)            # 0x2545F491
         + jnp.int32(seed))
    h = _mix32(h)
    # h ~ uniform over int32; drop iff h < INT32_MIN + round(p * 2^32).
    thresh = int(round(p * 4294967296.0)) - 2147483648
    thresh = max(-(2 ** 31), min(2 ** 31 - 1, thresh))
    drop = h < jnp.int32(thresh)
    scale = jnp.float32(1.0 / (1.0 - p))
    return jnp.where(drop, jnp.float32(0.0), y * scale)


# ----------------------------------------------------------------------
# Pallas kernels
# ----------------------------------------------------------------------
def _fused_conv_kernel(x_ref, w_ref, o_ref, *, bt, seq_len, p, seed):
    """Primary path: the x block is (bt*seq_len, C) = bt whole sequences.

    Circular taps are built in VMEM via jnp.roll on the C-wide data (cheap
    slice+concat on a tiny slab), so x is read from HBM exactly once."""
    c_in = x_ref.shape[-1]
    x0 = x_ref[...]                                        # (bt*L, C)
    x3 = x0.reshape(bt, seq_len, c_in)
    xm1 = jnp.roll(x3, 1, axis=1).reshape(x0.shape)        # x[t-1]
    xp1 = jnp.roll(x3, -1, axis=1).reshape(x0.shape)       # x[t+1]
    y = _three_tap_matmul(xm1, x0, xp1, w_ref)
    y = _apply_dropout(y, p=p, seed=seed, rows_per_block=bt * seq_len)
    o_ref[...] = y.astype(o_ref.dtype)


def _taps_conv_kernel(xm1_ref, x0_ref, xp1_ref, w_ref, o_ref, *, p, seed,
                      rows_per_block):
    """Fallback path (a single sequence's output exceeds the VMEM block budget):
    the wrapper materializes the rolled taps in HBM and the kernel tiles rows."""
    y = _three_tap_matmul(xm1_ref[...], x0_ref[...], xp1_ref[...], w_ref)
    y = _apply_dropout(y, p=p, seed=seed, rows_per_block=rows_per_block)
    o_ref[...] = y.astype(o_ref.dtype)


# ----------------------------------------------------------------------
# Block sizing
# ----------------------------------------------------------------------
def _choose_fused_bt(batch, seq_len, per_seq_bytes, block_target, block_cap):
    """Sequences per block for the fused path, or None to use the taps fallback."""
    if per_seq_bytes > block_cap:
        return None
    bt = max(1, min(batch, block_target // per_seq_bytes))
    if batch >= 2:
        # >= 2 grid steps so both of v7x's TensorCores get fed via "parallel".
        bt = min(bt, (batch + 1) // 2)
    # Sublane rule: (bt*L, C) / (bt*L, Dp) blocks need bt*L % 8 == 0 unless the
    # block covers the whole row axis.
    step = 8 // math.gcd(seq_len, 8)
    if bt % step != 0:
        bt = min(_round_up(bt, step), batch)
    if (bt * seq_len) % 8 != 0 and bt != batch:
        return None
    if bt * per_seq_bytes > block_cap:
        return None
    return bt


# ----------------------------------------------------------------------
# Wrapper (mirrors DataEmbedding_wo_pos_temp.forward)
# ----------------------------------------------------------------------
def data_embedding_wo_pos_temp(x, w_stack, x_mark=None, *, dropout_p=0.1,
                               train=False, seed=0):
    """Forward of DataEmbedding_wo_pos_temp: dropout(TokenEmbedding(x)).

    x:       (B, L, c_in)
    w_stack: (3, c_in, d_model) stacked circular-conv taps (init_token_embedding)
    x_mark:  ignored (the reference forward never uses it)
    seed:    Python int, only used when train=True and dropout_p > 0
    """
    del x_mark                                   # unused by the reference forward
    batch, seq_len, c_in = x.shape
    n_taps, c_w, d_model = w_stack.shape
    if n_taps != 3 or c_w != c_in:
        raise ValueError("w_stack must have shape (3, c_in, d_model)")

    # Lane-dense stores: pad d_model to a multiple of 128 on the (tiny) weight
    # and slice the output afterwards.  No-op when d_model is 128-aligned.
    d_pad = _round_up(d_model, _LANE)
    if d_pad != d_model:
        w_stack = jnp.pad(w_stack, ((0, 0), (0, 0), (0, d_pad - d_model)))

    p = float(dropout_p) if (train and float(dropout_p) > 0.0) else None
    # Static seed, pre-mixed in Python so per-block / per-seed streams decorrelate.
    seed_mixed = (int(seed) * 2654435761 + 1013904223) & 0xFFFFFFFF
    if seed_mixed >= 1 << 31:
        seed_mixed -= 1 << 32

    itemsize = jnp.dtype(x.dtype).itemsize
    block_target = _TRAIN_BLOCK_BYTES if p is not None else _EVAL_BLOCK_BYTES
    block_cap = 2 * block_target
    per_seq_bytes = seq_len * d_pad * itemsize
    rows = batch * seq_len

    x2d = x.reshape(rows, c_in)                  # free: leading-dim merge
    w_spec = pl.BlockSpec((3, c_in, d_pad), lambda i: (0, 0, 0))
    # NOTE: the weight block index never changes, so default double-buffering
    # wastes one (3, C, Dp) VMEM copy; pl.Buffered(1) would reclaim it but is
    # left off for portability (the weight is tiny for typical c_in).
    compiler_params = pltpu.CompilerParams(
        dimension_semantics=("parallel",),
        vmem_limit_bytes=_VMEM_LIMIT_BYTES,
    )

    bt = _choose_fused_bt(batch, seq_len, per_seq_bytes, block_target, block_cap)
    if bt is not None:
        # Primary path: x read from HBM once, circular taps built in VMEM.
        kernel = functools.partial(_fused_conv_kernel, bt=bt, seq_len=seq_len,
                                   p=p, seed=seed_mixed)
        y2d = pl.pallas_call(
            kernel,
            out_shape=jax.ShapeDtypeStruct((rows, d_pad), x.dtype),
            grid=(pl.cdiv(batch, bt),),
            in_specs=[pl.BlockSpec((bt * seq_len, c_in), lambda i: (i, 0)),
                      w_spec],
            out_specs=pl.BlockSpec((bt * seq_len, d_pad), lambda i: (i, 0)),
            compiler_params=compiler_params,
        )(x2d, w_stack)
    else:
        # Fallback for very long sequences: materialize the rolled taps in HBM
        # (extra ~2C/(C+D) traffic) and tile over rows in multiples of 8.
        xm1 = jnp.roll(x, 1, axis=1).reshape(rows, c_in)
        xp1 = jnp.roll(x, -1, axis=1).reshape(rows, c_in)
        tm = max(_SUBLANE,
                 (min(rows, block_target // (d_pad * itemsize)) // _SUBLANE)
                 * _SUBLANE)
        kernel = functools.partial(_taps_conv_kernel, p=p, seed=seed_mixed,
                                   rows_per_block=tm)
        tap_spec = pl.BlockSpec((tm, c_in), lambda i: (i, 0))
        y2d = pl.pallas_call(
            kernel,
            out_shape=jax.ShapeDtypeStruct((rows, d_pad), x.dtype),
            grid=(pl.cdiv(rows, tm),),
            in_specs=[tap_spec, tap_spec, tap_spec, w_spec],
            out_specs=pl.BlockSpec((tm, d_pad), lambda i: (i, 0)),
            compiler_params=compiler_params,
        )(xm1, x2d, xp1, w_stack)

    if d_pad != d_model:
        y2d = y2d[:, :d_model]
    return y2d.reshape(batch, seq_len, d_model)


# ----------------------------------------------------------------------
# Demo / self-check
# ----------------------------------------------------------------------
if __name__ == "__main__":
    B, L, C_IN, D_MODEL = 2, 16, 4, 128          # batch, seq_len, c_in, d_model

    key = jax.random.PRNGKey(0)
    kx, km, kw = jax.random.split(key, 3)
    x = jax.random.normal(kx, (B, L, C_IN), dtype=jnp.float32)
    x_mark = jax.random.normal(km, (B, L, 4), dtype=jnp.float32)  # unused by forward
    w_torch, w_stack = init_token_embedding(kw, C_IN, D_MODEL)

    # --- eval mode (nn.Dropout == identity) --------------------------------
    out = data_embedding_wo_pos_temp(x, w_stack, x_mark, dropout_p=0.1, train=False)
    out = jax.block_until_ready(out)
    assert out.shape == (B, L, D_MODEL) and out.dtype == x.dtype

    # plain-JAX reference of the circular Conv1d (k=3, padding=1, no bias)
    xm1 = jnp.roll(x, 1, axis=1)
    xp1 = jnp.roll(x, -1, axis=1)
    ref = (jnp.einsum("blc,dc->bld", xm1, w_torch[:, :, 0], precision="highest")
           + jnp.einsum("blc,dc->bld", x, w_torch[:, :, 1], precision="highest")
           + jnp.einsum("blc,dc->bld", xp1, w_torch[:, :, 2], precision="highest"))
    max_err = float(jnp.max(jnp.abs(out - ref)))
    # f32 MXU matmul is a multi-pass bf16 decomposition (~f32 accuracy); with
    # K = 3*c_in = 12 products the worst-case element error is well under 1e-3.
    assert max_err < 1e-3, f"mismatch vs reference: max abs err {max_err}"

    # --- train mode (fused inverted dropout) --------------------------------
    P_DROP = 0.1
    out_tr = data_embedding_wo_pos_temp(x, w_stack, x_mark, dropout_p=P_DROP,
                                        train=True, seed=1234)
    out_tr = jax.block_until_ready(out_tr)
    assert out_tr.shape == (B, L, D_MODEL)
    drop_frac = float(jnp.mean((out_tr == 0.0).astype(jnp.float32)))
    assert 0.01 < drop_frac < 0.30, f"dropout fraction {drop_frac} not near {P_DROP}"
    kept = out_tr != 0.0
    kept_err = float(jnp.max(jnp.abs(
        jnp.where(kept, out_tr * (1.0 - P_DROP) - out, 0.0))))
    assert kept_err < 1e-4, f"kept values are not scaled eval values: {kept_err}"

    print("KERNEL_OK")
</pallas_src>

<mosaic_0001>
module attributes {stable_mosaic.version = 11 : i64} {
  func.func @_fused_conv_kernel(%arg0: i32, %arg1: memref<16x4xf32, #tpu.memory_space<vmem>>, %arg2: memref<3x4x128xf32, #tpu.memory_space<vmem>>, %arg3: memref<16x128xf32, #tpu.memory_space<vmem>>) attributes {dimension_semantics = [#tpu.dimension_semantics<parallel>], iteration_bounds = array<i64: 2>, scalar_prefetch = 0 : i64, scratch_operands = 0 : i64, tpu.core_type = #tpu.core_type<tc>, window_params = [{transform_indices = @transform_0, window_bounds = array<i64: 16, 4>}, {pipeline_mode = #tpu.pipeline_mode<synchronous>, transform_indices = @transform_1, window_bounds = array<i64: 3, 4, 128>}, {transform_indices = @transform_2, window_bounds = array<i64: 16, 128>}]} {
    %c0 = arith.constant 0 : index
    %c0_0 = arith.constant 0 : index
    %0 = vector.load %arg1[%c0, %c0_0] : memref<16x4xf32, #tpu.memory_space<vmem>>, vector<16x4xf32>
    %1 = vector.shape_cast %0 : vector<16x4xf32> to vector<1x16x4xf32>
    %2 = vector.extract_strided_slice %1 {offsets = [0, 15, 0], sizes = [1, 1, 4], strides = [1, 1, 1]} : vector<1x16x4xf32> to vector<1x1x4xf32>
    %3 = vector.extract_strided_slice %1 {offsets = [0, 0, 0], sizes = [1, 15, 4], strides = [1, 1, 1]} : vector<1x16x4xf32> to vector<1x15x4xf32>
    %4 = tpu.concatenate %2, %3 in 1 : vector<1x1x4xf32>, vector<1x15x4xf32> -> vector<1x16x4xf32>
    %5 = vector.shape_cast %4 : vector<1x16x4xf32> to vector<16x4xf32>
    %6 = vector.extract_strided_slice %1 {offsets = [0, 1, 0], sizes = [1, 15, 4], strides = [1, 1, 1]} : vector<1x16x4xf32> to vector<1x15x4xf32>
    %7 = vector.extract_strided_slice %1 {offsets = [0, 0, 0], sizes = [1, 1, 4], strides = [1, 1, 1]} : vector<1x16x4xf32> to vector<1x1x4xf32>
    %8 = tpu.concatenate %6, %7 in 1 : vector<1x15x4xf32>, vector<1x1x4xf32> -> vector<1x16x4xf32>
    %9 = vector.shape_cast %8 : vector<1x16x4xf32> to vector<16x4xf32>
    %c0_1 = arith.constant 0 : index
    %c0_2 = arith.constant 0 : index
    %c0_3 = arith.constant 0 : index
    %10 = vector.load %arg2[%c0_1, %c0_2, %c0_3] : memref<3x4x128xf32, #tpu.memory_space<vmem>>, vector<1x4x128xf32>
    %11 = vector.shape_cast %10 : vector<1x4x128xf32> to vector<4x128xf32>
    %cst = arith.constant dense<0.000000e+00> : vector<16x128xf32>
    %12 = tpu.matmul %5, %11, %cst {dimension_numbers = #tpu.dot_dimension_numbers<[1], [0], [0], [1], [0, 0, 1, 1], [], []>} : vector<16x4xf32>, vector<4x128xf32>, vector<16x128xf32> -> vector<16x128xf32>
    %c1 = arith.constant 1 : index
    %c0_4 = arith.constant 0 : index
    %c0_5 = arith.constant 0 : index
    %13 = vector.load %arg2[%c1, %c0_4, %c0_5] : memref<3x4x128xf32, #tpu.memory_space<vmem>>, vector<1x4x128xf32>
    %14 = vector.shape_cast %13 : vector<1x4x128xf32> to vector<4x128xf32>
    %cst_6 = arith.constant dense<0.000000e+00> : vector<16x128xf32>
    %15 = tpu.matmul %0, %14, %cst_6 {dimension_numbers = #tpu.dot_dimension_numbers<[1], [0], [0], [1], [0, 0, 1, 1], [], []>} : vector<16x4xf32>, vector<4x128xf32>, vector<16x128xf32> -> vector<16x128xf32>
    %16 = arith.addf %12, %15 : vector<16x128xf32>
    %c2 = arith.constant 2 : index
    %c0_7 = arith.constant 0 : index
    %c0_8 = arith.constant 0 : index
    %17 = vector.load %arg2[%c2, %c0_7, %c0_8] : memref<3x4x128xf32, #tpu.memory_space<vmem>>, vector<1x4x128xf32>
    %18 = vector.shape_cast %17 : vector<1x4x128xf32> to vector<4x128xf32>
    %cst_9 = arith.constant dense<0.000000e+00> : vector<16x128xf32>
    %19 = tpu.matmul %9, %18, %cst_9 {dimension_numbers = #tpu.dot_dimension_numbers<[1], [0], [0], [1], [0, 0, 1, 1], [], []>} : vector<16x4xf32>, vector<4x128xf32>, vector<16x128xf32> -> vector<16x128xf32>
    %20 = arith.addf %16, %19 : vector<16x128xf32>
    %c0_10 = arith.constant 0 : index
    %c0_11 = arith.constant 0 : index
    %21 = vector.load %arg3[%c0_10, %c0_11] : memref<16x128xf32, #tpu.memory_space<vmem>>, vector<16x128xf32>
    tpu.vector_store %arg3[%c0_10, %c0_11], %20 {strides = array<i32>} : memref<16x128xf32, #tpu.memory_space<vmem>>, vector<16x128xf32>,
    return
  }
  func.func @transform_0(%arg0: i32) -> (i32, i32) {
    %c0_i32 = arith.constant 0 : i32
    %c0_i32_0 = arith.constant 0 : i32
    return %arg0, %c0_i32 : i32, i32
  }
  func.func @transform_1(%arg0: i32) -> (i32, i32, i32) {
    %c0_i32 = arith.constant 0 : i32
    %c0_i32_0 = arith.constant 0 : i32
    %c0_i32_1 = arith.constant 0 : i32
    %c0_i32_2 = arith.constant 0 : i32
    return %c0_i32, %c0_i32_0, %c0_i32_1 : i32, i32, i32
  }
  func.func @transform_2(%arg0: i32) -> (i32, i32) {
    %c0_i32 = arith.constant 0 : i32
    %c0_i32_0 = arith.constant 0 : i32
    return %arg0, %c0_i32 : i32, i32
  }
}

</mosaic_0001>

<bundles_post_ra>
// kernel: tpu_custom_call.1
= control target key start
LH: loop header
LB: loop body
LE: loop exit
PB: predicated region body
PF: predicated region fallthrough
CT: control target
= control target key end

     0   :  { %7 = vsyncpa [#allocation3], 0  ;;  %s796_s0 = inlined_call_operand.vmem [shape: f32[32,4], index: 0, kind: input, shape index: {}]   ;;  %s797_s1 = inlined_call_operand.vmem [shape: f32[3,4,128], index: 1, kind: input, shape index: {}]   ;;  %s798_s2 = inlined_call_operand.hbm [shape: f32[32,128], index: 2, kind: output, shape index: {}]  }
   0x1   :  { %9 = vsyncpa [#allocation3 + $0x1], 0  ;;  %s673_s9 = smov 0   ;;  %s675_s10 = smov 0  }
   0x2   :  { %s677_s11 = smov 0   ;;  %s679_s12 = smov 0  }
   0x3 LB: > { %s694_s13 = sadd.s32 4294967295, %s653_s12   ;;  %s498_s14 = sadd.s32 4294967294, %s653_s12   ;;  %s653_s12 = sphi %s679_s12, %s804_s12   ;;  %s649_s11 = sphi %s677_s11, %s803_s11   ;;  %s645_s10 = sphi %s675_s10, %s802_s10   ;;  %s641_s9 = sphi %s673_s9, %s801_s9  }
   0x4   : > { %s698_s15 = sadd.s32 1, %s653_s12   ;;  %s69_s16 = sadd.s32 1, %s649_s11 }
   0x5   : > { %s66_s17 = ssub.s32 %s653_s12, %s698_s15  ;;  %p79_p0 = scmp.ne.s32.totalorder %s649_s11, %s645_s10 }
   0x6   : > { %p67_p1 = scmp.eq.s32.totalorder %s66_s17, 0  ;;  %p80_p2 = scmp.eq.s32.totalorder %s694_s13, 1 }
   0x7   : > { %p85_p3 = scmp.ne.s32.totalorder %s645_s10, %s641_s9  ;;  %p86_p4 = scmp.eq.s32.totalorder %s498_s14, 1 }
   0x8   : > { %s709_s18 = scalar_select %p67_p1, %s649_s11, %s69_s16  }
   0x9   : > { %p711_p5 = por %p80_p2, %p79_p0  ;;  %p715_p6 = por %p86_p4, %p85_p3 }
   0xa   : > { %p501_p7 = scmp.ge.s32.totalorder %s653_s12, 1  ;;  %p116_p8 = scmp.lt.s32.totalorder %s653_s12, 3 }
   0xc   : > { %p117_p9 = pnand %p501_p7, %p116_p8 }
   0xd   : > { %v163_v0 = vld [vmem:[%s797_s1] sm:$0xf] (!%p117_p9)  ;;  %vm171_vm0 = vcmask (!%p117_p9), 1043456   ;;  %s503_s23 = sshll.u32 (!%p117_p9), %s694_s13, 1  ;;  %v512_v1 = vld [vmem:[%s797_s1 + $0x8] sm:$0xf] (!%p117_p9) }
   0xe   : > { %120 = sbr.rel (%p117_p9) target bundleno = 267 (0x10b), region = 28  ;;  %536 = vmatprep.subr.msk.mxu0 (!%p117_p9), %vm171_vm0, %v163_v0  ;;  %p139_p10 = scmp.lt.s32.totalorder (!%p117_p9), %s503_s23, 3  ;;  %v505_v2 = vld [vmem:[%s797_s1 + $0x4] sm:$0xf] (!%p117_p9)  ;;  %vm151_vm1 = vcmask (!%p117_p9), 1040384   ;;  %vm166_vm2 = vcmask (!%p117_p9), 31744  }
   0xf   : > { %537 = vmatpush3.msk.msra.mxu0 (!%p117_p9), %vm171_vm0, %v163_v0  ;;  %531 = vmatprep.subr.msk.mxu1 (!%p117_p9), %vm171_vm0, %v505_v2  ;;  %vm156_vm3 = vcmask (!%p117_p9), 1046528   ;;  %s135_s4 = sand.u32 (!%p117_p9), 1, %s645_s10   ;;  %s521_s8 = sshll.u32 (!%p117_p9), %s694_s13, 8 }
  0x10   : > { %541 = vmatprep.subr.msk.mxu0 (!%p117_p9), %vm171_vm0, %v512_v1  ;;  %532 = vmatpush3.msk.msra.mxu1 (!%p117_p9), %vm171_vm0, %v505_v2  ;;  %s502_s5 = sshll.u32 (!%p117_p9), %s135_s4, 4  ;;  %s753_s17 = scalar_lea.hbm (!%p117_p9), %s798_s2, %s521_s8 }
  0x11   : > { %s137_s6 = scalar_lea.vmem (!%p117_p9), [#allocation2], %s502_s5  ;;  %s755_s21 = scalar_lea.sflag (!%p117_p9), [#allocation3], %s135_s4 }
  0x12   : > { %s436_s7 = sshll.u32 (!%p117_p9), %s137_s6, 4  ;;  %s655_s13 = smov (!%p117_p9), [#allocation2]   ;;  %s748_s7 = int_to_ptr.vmem [resolvable:$true] %s436_s7 }
  0x13   : > { %s591_s22 = scalar_lea.vmem (!%p117_p9), %s748_s7, 256 }
  0x14   : > { %p592_p11 = scmp.ne.s32.totalorder (!%p117_p9), %s748_s7, %s591_s22 }
  0x15   : > { %s806_s23 = smov (!%p139_p10, %s503_s23), 3 }
  0x16   : > { %s504_s28 = sshll.u32 %s806_s23, 3  ;;  %p593_p12 = pnand %p592_p11, %p711_p5 }
  0x17   : > { %s142_s3 = scalar_lea.vmem %s796_s0, %s504_s28  ;;  %s595_s23 = sshll.u32 %s655_s13, 4  ;;  %s596_s23 = int_to_ptr.vmem [resolvable:$false] %s595_s23 }
  0x18   : > { %v145_v3 = vld [vmem:[%s142_s3] sm:$0xff]  ;;  %v146_v4 = vld [vmem:[%s142_s3 + $0x8] sm:$0xff]  ;;  %p594_p13 = pneg %p593_p12  ;;  %s597_s24 = scalar_lea.vmem %s596_s23, 512 }
  0x19   : > { %v148_v5 = vrot.slane %v146_v4, 7  ;;  %v152_v6 = vrot.slane %v145_v3, 7  ;;  %533 = vmatprep.mubr.msk.f32.mxu1 %vm166_vm2, %v145_v3  ;;  %v157_v7 = vrot.slane %v145_v3, 1  ;;  %v158_v8 = vrot.slane %v146_v4, 1  ;;  %p598_p0 = scmp.lt.s32.totalorder %s748_s7, %s596_s23  ;;  %p599_p1 = scmp.lt.s32.totalorder %s597_s24, %s591_s22 }
  0x1a   : > { %534 = vmatmul.mubr.msk.f32.vlgmr.msra.gmra.mrb[0].mxu1 %vm166_vm2, %v146_v4 }
  0x1b   : > { %v155_v9 = vsel %vm151_vm1, %v148_v5, %v152_v6  ;;  %v153_v10 = vsel %vm151_vm1, %v152_v6, %v148_v5  ;;  %v159_v11 = vsel %vm156_vm3, %v157_v7, %v158_v8  ;;  %v162_v12 = vsel %vm156_vm3, %v158_v8, %v157_v7  ;;  %p600_p2 = por %p599_p1, %p598_p0 }
  0x1c   : > { %538 = vmatprep.mubr.msk.f32.mxu0 %vm166_vm2, %v155_v9 }
  0x1d   : > { %539 = vmatmul.mubr.msk.f32.vlgmr.msra.gmra.mrb[0].mxu0 %vm166_vm2, %v153_v10  ;;  %p601_p3 = pnand %p600_p2, %p594_p13 }
  0x1e   : > { %542 = vmatpush3.msk.msra.mxu0 %vm171_vm0, %v512_v1  ;;  %543 = vmatprep.mubr.msk.f32.mxu0 %vm166_vm2, %v159_v11 }
  0x25   : > { %544 = vmatmul.mubr.msk.f32.vlgmr.msra.gmra.mrb[0].mxu0 %vm166_vm2, %v162_v12 }
  0xed   : > { %v535_v13 = vpop.f32.mrb[0].mxu1 }
  0xee   : > { %v241_v14 = vpop.f32.mrb[1].mxu1 }
  0xf8   : > { %v545_v15 = vpop.f32.mrb[0].mxu0 }
  0xf9   : > { %v546_v16 = vadd.f32 %v545_v15, %v535_v13  ;;  %v409_v17 = vpop.f32.mrb[1].mxu0 }
  0xfa   : > { %v547_v18 = vadd.f32 %v409_v17, %v241_v14 }
  0xfb   : > { %421 = vst [vmem:[%s137_s6 + $0x8] sm:$0xff] %v546_v16 }
  0xfc   : > { %420 = vst [vmem:[%s137_s6] sm:$0xff] %v547_v18 }
  0xfd   : > { %604 = shalt.err (!%p601_p3)
}
  0xfe   : > { %s605_s25 = scalar_lea.hbm %s753_s17, 256  ;;  %s609_s28 = scalar_lea.hbm %s798_s2, 512 }
  0xff   : > { %p606_p4 = scmp.ne.s32.totalorder %s753_s17, %s605_s25  ;;  %p610_p9 = scmp.lt.u32.totalorder %s753_s17, %s798_s2 }
 0x100   : > { %p611_p10 = scmp.lt.u32.totalorder %s609_s28, %s605_s25  ;;  %p613_p12 = scmp.lt.u32.totalorder %s605_s25, %s753_s17 }
 0x101   : > { %p607_p7 = pnand %p606_p4, %p711_p5 }
 0x102   : > { %p612_p11 = por %p611_p10, %p610_p9 }
 0x103   : > { %p608_p8 = pneg %p607_p7 }
 0x104   : > { %p614_p13 = por %p613_p12, %p612_p11 }
 0x106   : > { %p615_p0 = pnand %p614_p13, %p608_p8 }
 0x108   : > { %618 = shalt.err (!%p615_p0)
}
 0x109   : > { %s656_s3 = smov 128   ;;  %s657_s4 = smov 8  }
 0x10a   : > { %550 = dma.vmem_to_hbm [thread:$0]  (%p711_p5), %s748_s7, 256, %s753_s17, %s755_s21, %s656_s3, %s656_s3, %s657_s4  }
 0x10b PF: > { %p556_p1 = scmp.ge.s32.totalorder %s653_s12, 2  ;;  %s451_s5 = sand.u32 1, %s641_s9  }
 0x10c   : > { %s452_s6 = scalar_lea.sflag [#allocation3], %s451_s5 }
 0x10d   : > { %p553_p2 = pnand %p556_p1, %p715_p6 }
 0x10f   : > { %636 = dma.done.wait (!%p553_p2), %s452_s6, 256  }
 0x110   : > { %638 = vsyncadd (!%p553_p2), %s452_s6, 4294967040  ;;  %p12_p3 = scmp.ge.s32.totalorder %s698_s15, 4   ;;  %s801_s9 = smov %s645_s10 }
 0x111   : > { %s802_s10 = smov %s649_s11  ;;  %s803_s11 = smov %s709_s18 }
 0x112   : > { %s804_s12 = smov %s698_s15  ;;  %14 = sbr.rel (!%p12_p3) target bundleno = 3 (0x3), region = 65 }
 0x119   :  { %457 = vsyncpa [#allocation3], 1 }
 0x11a   :  { %459 = vsyncpa [#allocation3 + $0x1], 1 }

</bundles_post_ra>
